<compile_context>
chip_gen: v5e
topology: v5e:2x2
jax: 0.10.0
libtpu: 0.0.40
codegen_flags: <defaults>
</compile_context>

<pallas_src>
import functools

import jax
import jax.numpy as jnp
from jax.experimental import pallas as pl
from jax.experimental.pallas import tpu as pltpu

LANE = 128


def _round_up(v, m):
    return (v + m - 1) // m * m


# ---------------------------------------------------------------------------
# Pallas kernel: whole GCN forward for a single (padded) graph.
# Specialized to F_in == 1 (rank-1 first projection on the VPU).
# ---------------------------------------------------------------------------
def _gcn_forward_kernel(a_ref, x_ref, w1_ref, b1_ref, w2_ref, b2_ref,
                        wfc_ref, bfc_ref, out_ref, *, num_nodes, num_classes):
    a = a_ref[...]                                            # (NP, NP) bf16

    # --- GCNConv 1: A_hat @ (x @ W1) + b1, then ReLU ------------------------
    # F_in == 1  =>  x @ W1 is a rank-1 outer product; do it exactly in f32 on
    # the VPU, cast once to bf16 for the aggregation matmul.
    xw1 = x_ref[...] * w1_ref[...]                            # (NP,1)*(1,HP) -> (NP,HP) f32
    h = jnp.dot(a, xw1.astype(jnp.bfloat16),
                preferred_element_type=jnp.float32) + b1_ref[...]      # (NP, HP) f32
    h = jnp.maximum(h, 0.0)
    # F.dropout(p=0.5) is identity at inference time (eval mode).

    # --- GCNConv 2: A_hat @ (h @ W2) + b2, then ReLU ------------------------
    hw = jnp.dot(h.astype(jnp.bfloat16), w2_ref[...],
                 preferred_element_type=jnp.float32)                   # (NP, HP)
    h = jnp.dot(a, hw.astype(jnp.bfloat16),
                preferred_element_type=jnp.float32) + b2_ref[...]
    h = jnp.maximum(h, 0.0)

    # --- global_add_pool (single graph) as a masked-ones row matmul ---------
    # Padded A_hat rows are all-zero, so padded rows of h hold relu(bias);
    # the masked-ones row zeroes their contribution (one tiny MXU op).
    col = jax.lax.broadcasted_iota(jnp.int32, (1, h.shape[0]), 1)      # (1, NP)
    ones_row = (col < num_nodes).astype(jnp.float32)
    pooled = jnp.dot(ones_row, h, preferred_element_type=jnp.float32)  # (1, HP)

    # --- fc + log_softmax (mask padded class lanes) --------------------------
    logits = jnp.dot(pooled.astype(jnp.bfloat16), wfc_ref[...],
                     preferred_element_type=jnp.float32) + bfc_ref[...]  # (1, CP)
    ccol = jax.lax.broadcasted_iota(jnp.int32, logits.shape, 1)
    logits = jnp.where(ccol < num_classes, logits, jnp.float32(-1e30))
    m = jnp.max(logits, axis=-1, keepdims=True)
    lse = jnp.log(jnp.sum(jnp.exp(logits - m), axis=-1, keepdims=True)) + m
    out_ref[...] = logits - lse


# ---------------------------------------------------------------------------
# Plain-JAX glue: GCN normalization (self loops + D^-1/2 A D^-1/2) scattered
# directly into a padded dense (NP, NP) matrix (matches torch_geometric
# gcn_norm). Built ONCE per static graph, outside the per-call forward path.
# ---------------------------------------------------------------------------
def gcn_norm_dense(edge_index, edge_weight, num_nodes, padded_nodes=None,
                   dtype=jnp.float32):
    if padded_nodes is None:
        padded_nodes = num_nodes
    src = edge_index[0].astype(jnp.int32)
    dst = edge_index[1].astype(jnp.int32)
    if edge_weight is None:
        ew = jnp.ones((src.shape[0],), jnp.float32)
    else:
        ew = edge_weight.reshape(-1).astype(jnp.float32)

    loop = jnp.arange(num_nodes, dtype=jnp.int32)
    src = jnp.concatenate([src, loop])
    dst = jnp.concatenate([dst, loop])
    w = jnp.concatenate([ew, jnp.ones((num_nodes,), jnp.float32)])

    deg = jnp.zeros((num_nodes,), jnp.float32).at[dst].add(w)
    dinv = jnp.where(deg > 0, jax.lax.rsqrt(deg), 0.0)
    norm = dinv[src] * w * dinv[dst]

    # out[dst] += norm * (xW)[src]  ==>  A_hat[dst, src] += norm
    a_hat = jnp.zeros((padded_nodes, padded_nodes), jnp.float32).at[dst, src].add(norm)
    return a_hat.astype(dtype)


@functools.partial(jax.jit, static_argnames=("num_nodes", "num_classes"))
def gcn_forward(params_p, a_hat, x_p, num_nodes, num_classes):
    """Forward pass on a pre-built padded A_hat and pre-padded params/features.

    a_hat: (NP, NP) bf16 normalized adjacency (built once per graph).
    x_p:   (NP, 1)  f32 node features (F_in == 1).
    Returns (1, num_classes) log-probabilities.
    """
    c_pad = params_p["bfc"].shape[1]

    kernel = functools.partial(_gcn_forward_kernel,
                               num_nodes=num_nodes, num_classes=num_classes)

    # Single invocation: no grid, whole arrays resident in VMEM (everything is
    # <= 128x128 here), no pipeline prologue/epilogue or double-buffering.
    out = pl.pallas_call(
        kernel,
        out_shape=jax.ShapeDtypeStruct((1, c_pad), jnp.float32),
    )(a_hat, x_p, params_p["w1"], params_p["b1"], params_p["w2"],
      params_p["b2"], params_p["wfc"], params_p["bfc"])

    return out[:, :num_classes]


# ---------------------------------------------------------------------------
# Parameters: deterministic init at logical shapes + one-time tile padding.
# ---------------------------------------------------------------------------
def init_params(key, in_feature, hidden, num_classes):
    k1, k2, k3 = jax.random.split(key, 3)
    return {
        "w1": 0.1 * jax.random.normal(k1, (in_feature, hidden), jnp.float32),
        "b1": jnp.zeros((1, hidden), jnp.float32),
        "w2": 0.1 * jax.random.normal(k2, (hidden, hidden), jnp.float32),
        "b2": jnp.zeros((1, hidden), jnp.float32),
        "wfc": 0.1 * jax.random.normal(k3, (hidden, num_classes), jnp.float32),
        "bfc": jnp.zeros((1, num_classes), jnp.float32),
    }


def _pad2(a, shape, dtype):
    out = jnp.zeros(shape, dtype)
    return out.at[:a.shape[0], :a.shape[1]].set(a.astype(dtype))


def pad_params(params, h_pad, c_pad):
    """One-time lane/sublane padding of weights (done outside the jit path).

    w1 stays (1, h_pad) f32 — it is consumed by the VPU rank-1 outer product.
    MXU-side weights (w2, wfc) are stored in bf16.
    """
    assert params["w1"].shape[0] == 1, "kernel is specialized to F_in == 1"
    return {
        "w1": _pad2(params["w1"], (1, h_pad), jnp.float32),
        "b1": _pad2(params["b1"], (1, h_pad), jnp.float32),
        "w2": _pad2(params["w2"], (h_pad, h_pad), jnp.bfloat16),
        "b2": _pad2(params["b2"], (1, h_pad), jnp.float32),
        "wfc": _pad2(params["wfc"], (h_pad, c_pad), jnp.bfloat16),
        "bfc": _pad2(params["bfc"], (1, c_pad), jnp.float32),
    }


# ---------------------------------------------------------------------------
# Pure-JAX f32 reference (PyG ordering) for a tolerance check.
# ---------------------------------------------------------------------------
def gcn_reference(params, x, edge_index, edge_weight, num_nodes):
    a = gcn_norm_dense(edge_index, edge_weight, num_nodes)
    h = jnp.maximum(a @ (x @ params["w1"]) + params["b1"], 0.0)
    h = jnp.maximum(a @ (h @ params["w2"]) + params["b2"], 0.0)
    pooled = jnp.sum(h, axis=0, keepdims=True)
    logits = pooled @ params["wfc"] + params["bfc"]
    return jax.nn.log_softmax(logits, axis=-1)


if __name__ == "__main__":
    N, E, F_IN, HIDDEN, NUM_CLASSES = 25, 50, 1, 32, 4

    key = jax.random.PRNGKey(0)
    kx, ke, kw, kp = jax.random.split(key, 4)

    x = jax.random.normal(kx, (N, F_IN), jnp.float32)
    edge_index = jax.random.randint(ke, (2, E), 0, N, jnp.int32)
    # Positive edge weights: randn weights (as in the reference snippet) make
    # deg^-0.5 undefined (NaN) in torch as well, so use well-defined weights here.
    edge_mask = jax.random.uniform(kw, (E, 1), jnp.float32)

    n_pad = _round_up(N, LANE)
    h_pad = _round_up(HIDDEN, LANE)
    c_pad = _round_up(NUM_CLASSES, LANE)

    params = init_params(kp, F_IN, HIDDEN, NUM_CLASSES)
    params_p = pad_params(params, h_pad=h_pad, c_pad=c_pad)

    # Static graph: build the normalized dense adjacency ONCE and reuse it for
    # every forward call (hoisted out of the per-call path per perf review).
    a_hat = gcn_norm_dense(edge_index, edge_mask, N,
                           padded_nodes=n_pad, dtype=jnp.bfloat16)      # (NP, NP)
    a_hat = jax.block_until_ready(a_hat)

    # Node features zero-padded to (NP, 1) (exact math: zero rows).
    x_p = jnp.zeros((n_pad, F_IN), jnp.float32).at[:N, :].set(x)

    out = gcn_forward(params_p, a_hat, x_p, N, NUM_CLASSES)
    out = jax.block_until_ready(out)

    ref = gcn_reference(params, x, edge_index, edge_mask, N)

    assert out.shape == (1, NUM_CLASSES)
    assert bool(jnp.all(jnp.isfinite(out)))
    # log_softmax rows must exponentiate-sum to 1
    assert bool(jnp.allclose(jnp.sum(jnp.exp(out), axis=-1), 1.0, atol=1e-5))
    # bf16 MXU path vs f32 reference (loose tolerance for bf16 rounding)
    assert bool(jnp.allclose(out, ref, atol=1e-1, rtol=1e-1))
    print("KERNEL_OK")
</pallas_src>

<mosaic_0001>
module attributes {stable_mosaic.version = 11 : i64} {
  func.func @_gcn_forward_kernel(%arg0: memref<128x128xbf16, #tpu.memory_space<vmem>>, %arg1: memref<128x1xf32, #tpu.memory_space<vmem>>, %arg2: memref<1x128xf32, #tpu.memory_space<vmem>>, %arg3: memref<1x128xf32, #tpu.memory_space<vmem>>, %arg4: memref<128x128xbf16, #tpu.memory_space<vmem>>, %arg5: memref<1x128xf32, #tpu.memory_space<vmem>>, %arg6: memref<128x128xbf16, #tpu.memory_space<vmem>>, %arg7: memref<1x128xf32, #tpu.memory_space<vmem>>, %arg8: memref<1x128xf32, #tpu.memory_space<vmem>>) attributes {dimension_semantics = [], scalar_prefetch = 0 : i64, scratch_operands = 0 : i64, tpu.core_type = #tpu.core_type<tc>} {
    %c0 = arith.constant 0 : index
    %c0_0 = arith.constant 0 : index
    %0 = vector.load %arg0[%c0, %c0_0] : memref<128x128xbf16, #tpu.memory_space<vmem>>, vector<128x128xbf16>
    %c0_1 = arith.constant 0 : index
    %c0_2 = arith.constant 0 : index
    %1 = vector.load %arg1[%c0_1, %c0_2] : memref<128x1xf32, #tpu.memory_space<vmem>>, vector<128x1xf32>
    %c0_3 = arith.constant 0 : index
    %c0_4 = arith.constant 0 : index
    %2 = vector.load %arg2[%c0_3, %c0_4] : memref<1x128xf32, #tpu.memory_space<vmem>>, vector<1x128xf32>
    %3 = vector.broadcast %1 : vector<128x1xf32> to vector<128x128xf32>
    %4 = vector.broadcast %2 : vector<1x128xf32> to vector<128x128xf32>
    %5 = arith.mulf %3, %4 : vector<128x128xf32>
    %6 = arith.truncf %5 : vector<128x128xf32> to vector<128x128xbf16>
    %cst = arith.constant dense<0.000000e+00> : vector<128x128xf32>
    %7 = tpu.matmul %0, %6, %cst {dimension_numbers = #tpu.dot_dimension_numbers<[1], [0], [0], [1], [0, 0, 1, 1], [], []>} : vector<128x128xbf16>, vector<128x128xbf16>, vector<128x128xf32> -> vector<128x128xf32>
    %c0_5 = arith.constant 0 : index
    %c0_6 = arith.constant 0 : index
    %8 = vector.load %arg3[%c0_5, %c0_6] : memref<1x128xf32, #tpu.memory_space<vmem>>, vector<1x128xf32>
    %9 = vector.broadcast %8 : vector<1x128xf32> to vector<128x128xf32>
    %10 = arith.addf %7, %9 : vector<128x128xf32>
    %cst_7 = arith.constant 0.000000e+00 : f32
    %11 = vector.broadcast %cst_7 : f32 to vector<128x128xf32>
    %12 = arith.maximumf %10, %11 : vector<128x128xf32>
    %13 = arith.truncf %12 : vector<128x128xf32> to vector<128x128xbf16>
    %c0_8 = arith.constant 0 : index
    %c0_9 = arith.constant 0 : index
    %14 = vector.load %arg4[%c0_8, %c0_9] : memref<128x128xbf16, #tpu.memory_space<vmem>>, vector<128x128xbf16>
    %cst_10 = arith.constant dense<0.000000e+00> : vector<128x128xf32>
    %15 = tpu.matmul %13, %14, %cst_10 {dimension_numbers = #tpu.dot_dimension_numbers<[1], [0], [0], [1], [0, 0, 1, 1], [], []>} : vector<128x128xbf16>, vector<128x128xbf16>, vector<128x128xf32> -> vector<128x128xf32>
    %16 = arith.truncf %15 : vector<128x128xf32> to vector<128x128xbf16>
    %cst_11 = arith.constant dense<0.000000e+00> : vector<128x128xf32>
    %17 = tpu.matmul %0, %16, %cst_11 {dimension_numbers = #tpu.dot_dimension_numbers<[1], [0], [0], [1], [0, 0, 1, 1], [], []>} : vector<128x128xbf16>, vector<128x128xbf16>, vector<128x128xf32> -> vector<128x128xf32>
    %c0_12 = arith.constant 0 : index
    %c0_13 = arith.constant 0 : index
    %18 = vector.load %arg5[%c0_12, %c0_13] : memref<1x128xf32, #tpu.memory_space<vmem>>, vector<1x128xf32>
    %19 = vector.broadcast %18 : vector<1x128xf32> to vector<128x128xf32>
    %20 = arith.addf %17, %19 : vector<128x128xf32>
    %cst_14 = arith.constant 0.000000e+00 : f32
    %21 = vector.broadcast %cst_14 : f32 to vector<128x128xf32>
    %22 = arith.maximumf %20, %21 : vector<128x128xf32>
    %23 = tpu.iota {dimensions = array<i32: 1>} : vector<1x128xi32>
    %c25_i32 = arith.constant 25 : i32
    %24 = vector.broadcast %c25_i32 : i32 to vector<1x128xi32>
    %25 = arith.cmpi slt, %23, %24 : vector<1x128xi32>
    %26 = arith.extui %25 : vector<1x128xi1> to vector<1x128xi32>
    %27 = arith.sitofp %26 : vector<1x128xi32> to vector<1x128xf32>
    %cst_15 = arith.constant dense<0.000000e+00> : vector<1x128xf32>
    %28 = tpu.matmul %27, %22, %cst_15 {dimension_numbers = #tpu.dot_dimension_numbers<[1], [0], [0], [1], [0, 0, 1, 1], [], []>} : vector<1x128xf32>, vector<128x128xf32>, vector<1x128xf32> -> vector<1x128xf32>
    %29 = arith.truncf %28 : vector<1x128xf32> to vector<1x128xbf16>
    %c0_16 = arith.constant 0 : index
    %c0_17 = arith.constant 0 : index
    %30 = vector.load %arg6[%c0_16, %c0_17] : memref<128x128xbf16, #tpu.memory_space<vmem>>, vector<128x128xbf16>
    %cst_18 = arith.constant dense<0.000000e+00> : vector<1x128xf32>
    %31 = tpu.matmul %29, %30, %cst_18 {dimension_numbers = #tpu.dot_dimension_numbers<[1], [0], [0], [1], [0, 0, 1, 1], [], []>} : vector<1x128xbf16>, vector<128x128xbf16>, vector<1x128xf32> -> vector<1x128xf32>
    %c0_19 = arith.constant 0 : index
    %c0_20 = arith.constant 0 : index
    %32 = vector.load %arg7[%c0_19, %c0_20] : memref<1x128xf32, #tpu.memory_space<vmem>>, vector<1x128xf32>
    %33 = arith.addf %31, %32 : vector<1x128xf32>
    %34 = tpu.iota {dimensions = array<i32: 1>} : vector<1x128xi32>
    %c4_i32 = arith.constant 4 : i32
    %35 = vector.broadcast %c4_i32 : i32 to vector<1x128xi32>
    %36 = arith.cmpi slt, %34, %35 : vector<1x128xi32>
    %cst_21 = arith.constant -1.000000e+30 : f32
    %37 = vector.broadcast %cst_21 : f32 to vector<1x128xf32>
    %38 = arith.select %36, %33, %37 : vector<1x128xi1>, vector<1x128xf32>
    %cst_22 = arith.constant dense<0xFF800000> : vector<1xf32>
    %39 = vector.multi_reduction <maximumf>, %38, %cst_22 [1] : vector<1x128xf32> to vector<1xf32>
    %40 = vector.shape_cast %39 : vector<1xf32> to vector<1x1xf32>
    %41 = vector.broadcast %40 : vector<1x1xf32> to vector<1x128xf32>
    %42 = arith.subf %38, %41 : vector<1x128xf32>
    %43 = math.exp %42 : vector<1x128xf32>
    %cst_23 = arith.constant dense<0.000000e+00> : vector<1xf32>
    %44 = vector.multi_reduction <add>, %43, %cst_23 [1] : vector<1x128xf32> to vector<1xf32>
    %45 = vector.shape_cast %44 : vector<1xf32> to vector<1x1xf32>
    %46 = math.log %45 : vector<1x1xf32>
    %47 = arith.addf %46, %40 : vector<1x1xf32>
    %48 = vector.broadcast %47 : vector<1x1xf32> to vector<1x128xf32>
    %49 = arith.subf %38, %48 : vector<1x128xf32>
    %c0_24 = arith.constant 0 : index
    %c0_25 = arith.constant 0 : index
    %50 = vector.load %arg8[%c0_24, %c0_25] : memref<1x128xf32, #tpu.memory_space<vmem>>, vector<1x128xf32>
    tpu.vector_store %arg8[%c0_24, %c0_25], %49 {strides = array<i32>} : memref<1x128xf32, #tpu.memory_space<vmem>>, vector<1x128xf32>,
    return
  }
}

</mosaic_0001>

<bundles_post_ra>
// kernel: gcn_forward.1
= control target key start
LH: loop header
LB: loop body
LE: loop exit
PB: predicated region body
PF: predicated region fallthrough
CT: control target
= control target key end

     0   :  { %13 = vsyncpa [#allocation3], 0  ;;  %s1151_s0 = inlined_call_operand.vmem [shape: bf16[128,128], index: 0, kind: input, shape index: {}]   ;;  %s1152_s1 = inlined_call_operand.vmem [shape: f32[128,1], index: 1, kind: input, shape index: {}]   ;;  %s1153_s2 = inlined_call_operand.vmem [shape: f32[1,128], index: 2, kind: input, shape index: {}]   ;;  %s1154_s3 = inlined_call_operand.hbm [shape: f32[1,128], index: 3, kind: input, shape index: {}]   ;;  %s1155_s4 = inlined_call_operand.vmem [shape: bf16[128,128], index: 4, kind: input, shape index: {}]   ;;  %s1156_s5 = inlined_call_operand.hbm [shape: f32[1,128], index: 5, kind: input, shape index: {}]   ;;  %s1157_s6 = inlined_call_operand.hbm [shape: bf16[128,128], index: 6, kind: input, shape index: {}]   ;;  %s1158_s7 = inlined_call_operand.hbm [shape: f32[1,128], index: 7, kind: input, shape index: {}]   ;;  %s1159_s8 = inlined_call_operand.hbm [shape: f32[1,128], index: 8, kind: output, shape index: {}]  }
   0x1   :  { %14 = vsyncpa [#allocation6], 0 }
   0x2   :  { %15 = vsyncpa [#allocation9], 0  ;;  %s41_s29 = sshll.u32 %s1156_s5, 4  ;;  %s42_s29 = int_to_ptr.hbm [resolvable:$true] %s41_s29 }
   0x3   :  { %16 = vsyncpa [#allocation4], 0  ;;  %s951_s30 = smov [#allocation5]   ;;  %s28_s12 = sshll.u32 %s1154_s3, 4  ;;  %s29_s12 = int_to_ptr.hbm [resolvable:$true] %s28_s12 }
   0x4   :  { %s43_s9 = sshll.u32 %s951_s30, 4  ;;  %s952_s13 = smov [#allocation2]   ;;  %s44_s9 = int_to_ptr.vmem [resolvable:$true] %s43_s9 }
   0x5   :  { %46 = dma.hbm_to_vmem [thread:$0]  %s42_s29, 16, %s44_s9, [#allocation6]  }
   0x6   :  { %s30_s14 = sshll.u32 %s952_s13, 4  ;;  %s51_s17 = sshll.u32 %s1157_s6, 4  ;;  %s31_s14 = int_to_ptr.vmem [resolvable:$true] %s30_s14  ;;  %s52_s17 = int_to_ptr.hbm [resolvable:$true] %s51_s17 }
   0x7   :  { %33 = dma.hbm_to_vmem [thread:$0]  %s29_s12, 16, %s31_s14, [#allocation3]  }
   0x8   :  { %s953_s5 = smov [#allocation7]   ;;  %s65_s21 = sshll.u32 %s1158_s7, 4  ;;  %s66_s21 = int_to_ptr.hbm [resolvable:$true] %s65_s21 }
   0x9   :  { %s53_s18 = sshll.u32 %s953_s5, 4  ;;  %s954_s22 = smov 64   ;;  %s54_s18 = int_to_ptr.vmem [resolvable:$true] %s53_s18 }
   0xa   :  { %s955_s3 = smov 4   ;;  %s956_s23 = smov [#allocation8]  }
   0xb   :  { %59 = dma.hbm_to_vmem [thread:$0]  %s52_s17, 1024, %s54_s18, [#allocation6], %s954_s22, %s954_s22, %s955_s3  }
   0xc   :  { %s67_s24 = sshll.u32 %s956_s23, 4  ;;  %s68_s24 = int_to_ptr.vmem [resolvable:$true] %s67_s24 }
   0xd   :  { %70 = dma.hbm_to_vmem [thread:$0]  %s66_s21, 16, %s68_s24, [#allocation9]  }
   0xe   :  { %943 = dma.done.wait [#allocation3], 16  }
   0xf   :  { %944 = vsyncadd [#allocation3], 4294967280 }
  0x10   :  { %945 = dma.done.wait [#allocation6], 1040  }
  0x11   :  { %946 = vsyncadd [#allocation6], 4294966256 }
  0x12   :  { %947 = dma.done.wait [#allocation9], 16  }
  0x13   :  { %948 = vsyncadd [#allocation9], 4294967280  ;;  %v957_v0 = vmov 0   ;;  %v117_v1 = vld [vmem:[%s1152_s1 + $0x70] sm:$0xff]  ;;  %v115_v2 = vld [vmem:[%s1152_s1 + $0x60] sm:$0xff]  ;;  %vm648_vm2 = vcmask 1040384  }
  0x14   :  { %815 = vset.pattern.permute.xlu2 %v957_v0  ;;  %814 = vset.pattern.permute.xlu1 %v957_v0  ;;  %v113_v3 = vld [vmem:[%s1152_s1 + $0x50] sm:$0xff]  ;;  %v118_v4 = vld [vmem:[%s1152_s1 + $0x78] sm:$0xff]  ;;  %v116_v5 = vld [vmem:[%s1152_s1 + $0x68] sm:$0xff]  ;;  %s670_s13 = sshll.u32 %s1159_s8, 4  ;;  %s671_s13 = int_to_ptr.hbm [resolvable:$true] %s670_s13 }
  0x15   :  { %813 = vset.pattern.permute.xlu0 %v957_v0  ;;  %182 = vperm.xlu1 %814, %v115_v2   ;;  %v114_v6 = vld [vmem:[%s1152_s1 + $0x58] sm:$0xff]  ;;  %v112_v7 = vld [vmem:[%s1152_s1 + $0x48] sm:$0xff]  ;;  %v111_v8 = vld [vmem:[%s1152_s1 + $0x40] sm:$0xff] }
  0x16   :  { %192 = vperm.xlu0 %813, %v117_v1   ;;  %172 = vperm.xlu2 %815, %v113_v3   ;;  %v109_v9 = vld [vmem:[%s1152_s1 + $0x30] sm:$0xff]  ;;  %v110_v10 = vld [vmem:[%s1152_s1 + $0x38] sm:$0xff]  ;;  %v107_v11 = vld [vmem:[%s1152_s1 + $0x20] sm:$0xff] }
  0x17   :  { %v108_v12 = vld [vmem:[%s1152_s1 + $0x28] sm:$0xff]  ;;  %v106_v13 = vld [vmem:[%s1152_s1 + $0x18] sm:$0xff]  ;;  %v105_v14 = vld [vmem:[%s1152_s1 + $0x10] sm:$0xff] }
  0x18   :  { %v103_v15 = vld [vmem:[%s1152_s1] sm:$0xff]  ;;  %v104_v16 = vld [vmem:[%s1152_s1 + $0x8] sm:$0xff]  ;;  %v1083_v60 = vld [vmem:[%s1151_s0 + $0x10] sm:$0xff] }
  0x19   :  { %v816_v20 = vld [vmem:[%s1153_s2] ss:$0 sm:$0xff]  ;;  %v1077_v59 = vld [vmem:[%s1151_s0 + $0x8] sm:$0xff]  ;;  %v1089_v61 = vld [vmem:[%s1151_s0 + $0x18] sm:$0xff] }
  0x1a   :  { %v1071_v58 = vld [vmem:[%s1151_s0] sm:$0xff]  ;;  %v795_v63 = vld [vmem:[%s1155_s4 + $0x38] sm:$0xff]  ;;  %v1104_v0 = vld [vmem:[%s1151_s0 + $0x28] sm:$0xff] }
  0x1b   :  { %v1095_v62 = vld [vmem:[%s1151_s0 + $0x20] sm:$0xff]  ;;  %416 = vmatpush.bf16.msra.mxu1 %v795_v63  ;;  %v794_v1 = vld [vmem:[%s1155_s4 + $0x30] sm:$0xff]  ;;  %v793_v2 = vld [vmem:[%s1155_s4 + $0x28] sm:$0xff] }
  0x1c   :  { %v792_v3 = vld [vmem:[%s1155_s4 + $0x20] sm:$0xff] }
  0x1d   :  { %187 = vperm.xlu1 %814, %v116_v5   ;;  %v791_v5 = vld [vmem:[%s1155_s4 + $0x18] sm:$0xff] }
  0x1e   :  { %197 = vperm.xlu0 %813, %v118_v4   ;;  %177 = vperm.xlu2 %815, %v114_v6   ;;  %v1119_v4 = vld [vmem:[%s1151_s0 + $0x30] sm:$0xff] }
  0x1f   :  { %417 = vmatpush.bf16.msra.mxu1 %v794_v1  ;;  %v790_v6 = vld [vmem:[%s1155_s4 + $0x10] sm:$0xff] }
  0x23   :  { %418 = vmatpush.bf16.msra.mxu1 %v793_v2 }
  0x25   :  { %167 = vperm.xlu1 %814, %v112_v7   ;;  %v789_v7 = vld [vmem:[%s1155_s4 + $0x8] sm:$0xff] }
  0x26   :  { %162 = vperm.xlu0 %813, %v111_v8   ;;  %152 = vperm.xlu2 %815, %v109_v9   ;;  %v788_v8 = vld [vmem:[%s1155_s4] sm:$0xff]  ;;  %v1137_v9 = vld [vmem:[%s1151_s0 + $0x38] sm:$0xff]  ;;  %s959_s0 = smov [#allocation10]  }
  0x27   :  { %419 = vmatpush.bf16.msra.mxu1 %v792_v3  ;;  %s668_s4 = sshll.u32 %s959_s0, 4  ;;  %s669_s4 = int_to_ptr.vmem [resolvable:$true] %s668_s4 }
  0x2b   :  { %420 = vmatpush.bf16.msra.mxu1 %v791_v5 }
  0x2d   :  { %142 = vperm.xlu1 %814, %v107_v11   ;;  %v817_v11 = vld [vmem:[#allocation2] ss:$0 sm:$0xff] }
  0x2e   :  { %157 = vperm.xlu0 %813, %v110_v10   ;;  %147 = vperm.xlu2 %815, %v108_v12  }
  0x2f   :  { %421 = vmatpush.bf16.msra.mxu1 %v790_v6 }
  0x33   :  { %422 = vmatpush.bf16.msra.mxu1 %v789_v7 }
  0x35   :  { %137 = vperm.xlu1 %814, %v106_v13  }
  0x36   :  { %132 = vperm.xlu0 %813, %v105_v14   ;;  %122 = vperm.xlu2 %815, %v103_v15  }
  0x37   :  { %423 = vmatpush.bf16.msra.mxu1 %v788_v8 }
  0x3e   :  { %127 = vperm.xlu0 %813, %v104_v16  }
  0x70   :  { %v173_v17 = vpop.permute.xlu2 %172 }
  0x71   :  { %v213_v29 = vmul.f32 %v816_v20, %v173_v17 }
  0x78   :  { %v178_v21 = vpop.permute.xlu2 %177 }
  0x79   :  { %v214_v30 = vmul.f32 %v816_v20, %v178_v21 }
  0x7b   :  { %v224_v37 = vpack.c.bf16 %v214_v30, %v213_v29 }
  0x80   :  { %v153_v34 = vpop.permute.xlu2 %152 }
  0x81   :  { %v209_v41 = vmul.f32 %v816_v20, %v153_v34 }
  0x87   :  { %v183_v19 = vpop.permute.xlu1 %182 }
  0x88   :  { %v193_v18 = vpop.permute.xlu0 %192  ;;  %v215_v28 = vmul.f32 %v816_v20, %v183_v19  ;;  %v148_v45 = vpop.permute.xlu2 %147 }
  0x89   :  { %v217_v24 = vmul.f32 %v816_v20, %v193_v18  ;;  %v208_v46 = vmul.f32 %v816_v20, %v148_v45 }
  0x8f   :  { %v188_v23 = vpop.permute.xlu1 %187 }
  0x90   :  { %v198_v22 = vpop.permute.xlu0 %197  ;;  %v216_v26 = vmul.f32 %v816_v20, %v188_v23  ;;  %v123_v53 = vpop.permute.xlu2 %122 }
  0x91   :  { %v218_v25 = vmul.f32 %v816_v20, %v198_v22  ;;  %v203_v55 = vmul.f32 %v816_v20, %v123_v53 }
  0x92   :  { %v225_v31 = vpack.c.bf16 %v216_v26, %v215_v28 }
  0x93   :  { %v226_v27 = vpack.c.bf16 %v218_v25, %v217_v24 }
  0x95   :  { %279 = vmatpush.bf16.msra.mxu0 %v226_v27 }
  0x97   :  { %v168_v32 = vpop.permute.xlu1 %167 }
  0x98   :  { %v163_v33 = vpop.permute.xlu0 %162  ;;  %v212_v35 = vmul.f32 %v816_v20, %v168_v32 }
  0x99   :  { %280 = vmatpush.bf16.msra.mxu0 %v225_v31  ;;  %v211_v36 = vmul.f32 %v816_v20, %v163_v33 }
  0x9b   :  { %v223_v38 = vpack.c.bf16 %v212_v35, %v211_v36 }
  0x9d   :  { %281 = vmatpush.bf16.msra.mxu0 %v224_v37 }
  0x9f   :  { %v143_v40 = vpop.permute.xlu1 %142 }
  0xa0   :  { %v158_v39 = vpop.permute.xlu0 %157  ;;  %v207_v43 = vmul.f32 %v816_v20, %v143_v40 }
  0xa1   :  { %v210_v42 = vmul.f32 %v816_v20, %v158_v39  ;;  %282 = vmatpush.bf16.msra.mxu0 %v223_v38 }
  0xa2   :  { %v221_v47 = vpack.c.bf16 %v208_v46, %v207_v43 }
  0xa3   :  { %v222_v44 = vpack.c.bf16 %v210_v42, %v209_v41 }
  0xa5   :  { %283 = vmatpush.bf16.msra.mxu0 %v222_v44 }
  0xa7   :  { %v138_v48 = vpop.permute.xlu1 %137 }
  0xa8   :  { %v133_v49 = vpop.permute.xlu0 %132  ;;  %v206_v50 = vmul.f32 %v816_v20, %v138_v48 }
  0xa9   :  { %v205_v51 = vmul.f32 %v816_v20, %v133_v49  ;;  %284 = vmatpush.bf16.msra.mxu0 %v221_v47 }
  0xab   :  { %v220_v52 = vpack.c.bf16 %v206_v50, %v205_v51 }
  0xad   :  { %285 = vmatpush.bf16.msra.mxu0 %v220_v52 }
  0xb0   :  { %v128_v54 = vpop.permute.xlu0 %127 }
  0xb1   :  { %v204_v56 = vmul.f32 %v816_v20, %v128_v54 }
  0xb3   :  { %v219_v57 = vpack.c.bf16 %v204_v56, %v203_v55 }
  0xb5   :  { %286 = vmatpush.bf16.msra.mxu0 %v219_v57 }
  0xb8   :  { %287 = vmatmul.bf16.vlgmr.msra.gmra.mxu0 %v1071_v58 }
  0xc8   :  { %292 = vmatmul.bf16.gmra.mxu0 %v1077_v59 }
  0xd8   :  { %297 = vmatmul.bf16.gmra.mxu0 %v1083_v60 }
  0xe8   :  { %302 = vmatmul.bf16.gmra.mxu0 %v1089_v61 }
  0xf8   :  { %307 = vmatmul.bf16.gmra.mxu0 %v1095_v62 }
 0x108   :  { %312 = vmatmul.bf16.gmra.mxu0 %v1104_v0 }
 0x118   :  { %317 = vmatmul.bf16.gmra.mxu0 %v1119_v4 }
 0x128   :  { %322 = vmatmul.bf16.gmra.mxu0 %v1137_v9 }
 0x135   :  { %v288_v10 = vpop.f32.mrf.mxu0 }
 0x136   :  { %v289_v12 = vadd.f32 %v817_v11, %v288_v10 }
 0x138   :  { %v328_v15 = vmax.f32 %v289_v12, 0.0 }
 0x13d   :  { %v290_v13 = vpop.f32.mrf.mxu0 }
 0x13e   :  { %v291_v14 = vadd.f32 %v817_v11, %v290_v13 }
 0x140   :  { %v329_v16 = vmax.f32 %v291_v14, 0.0 }
 0x142   :  { %v344_v17 = vpack.c.bf16 %v329_v16, %v328_v15 }
 0x144   :  { %424 = vmatmul.bf16.vlgmr.msra.gmra.mxu1 %v344_v17 }
 0x145   :  { %v293_v18 = vpop.f32.mrf.mxu0 }
 0x146   :  { %v294_v19 = vadd.f32 %v817_v11, %v293_v18 }
 0x148   :  { %v330_v22 = vmax.f32 %v294_v19, 0.0 }
 0x14d   :  { %v295_v20 = vpop.f32.mrf.mxu0 }
 0x14e   :  { %v296_v21 = vadd.f32 %v817_v11, %v295_v20 }
 0x150   :  { %v331_v23 = vmax.f32 %v296_v21, 0.0 }
 0x152   :  { %v345_v24 = vpack.c.bf16 %v331_v23, %v330_v22 }
 0x154   :  { %429 = vmatmul.bf16.gmra.mxu1 %v345_v24 }
 0x155   :  { %v298_v25 = vpop.f32.mrf.mxu0 }
 0x156   :  { %v299_v26 = vadd.f32 %v817_v11, %v298_v25 }
 0x158   :  { %v332_v29 = vmax.f32 %v299_v26, 0.0 }
 0x15d   :  { %v300_v27 = vpop.f32.mrf.mxu0 }
 0x15e   :  { %v301_v28 = vadd.f32 %v817_v11, %v300_v27 }
 0x160   :  { %v333_v30 = vmax.f32 %v301_v28, 0.0 }
 0x162   :  { %v346_v31 = vpack.c.bf16 %v333_v30, %v332_v29 }
 0x164   :  { %434 = vmatmul.bf16.gmra.mxu1 %v346_v31 }
 0x165   :  { %v303_v32 = vpop.f32.mrf.mxu0 }
 0x166   :  { %v304_v33 = vadd.f32 %v817_v11, %v303_v32 }
 0x168   :  { %v334_v36 = vmax.f32 %v304_v33, 0.0 }
 0x16d   :  { %v305_v34 = vpop.f32.mrf.mxu0 }
 0x16e   :  { %v306_v35 = vadd.f32 %v817_v11, %v305_v34 }
 0x170   :  { %v335_v37 = vmax.f32 %v306_v35, 0.0 }
 0x172   :  { %v347_v38 = vpack.c.bf16 %v335_v37, %v334_v36 }
 0x174   :  { %439 = vmatmul.bf16.gmra.mxu1 %v347_v38 }
 0x175   :  { %v308_v39 = vpop.f32.mrf.mxu0 }
 0x176   :  { %v309_v40 = vadd.f32 %v817_v11, %v308_v39 }
 0x178   :  { %v336_v43 = vmax.f32 %v309_v40, 0.0 }
 0x17d   :  { %v310_v41 = vpop.f32.mrf.mxu0 }
 0x17e   :  { %v311_v42 = vadd.f32 %v817_v11, %v310_v41 }
 0x180   :  { %v337_v44 = vmax.f32 %v311_v42, 0.0 }
 0x182   :  { %v348_v45 = vpack.c.bf16 %v337_v44, %v336_v43 }
 0x184   :  { %444 = vmatmul.bf16.gmra.mxu1 %v348_v45 }
 0x185   :  { %v313_v46 = vpop.f32.mrf.mxu0 }
 0x186   :  { %v314_v47 = vadd.f32 %v817_v11, %v313_v46 }
 0x188   :  { %v338_v50 = vmax.f32 %v314_v47, 0.0 }
 0x18d   :  { %v315_v48 = vpop.f32.mrf.mxu0 }
 0x18e   :  { %v316_v49 = vadd.f32 %v817_v11, %v315_v48 }
 0x190   :  { %v339_v51 = vmax.f32 %v316_v49, 0.0 }
 0x192   :  { %v349_v52 = vpack.c.bf16 %v339_v51, %v338_v50 }
 0x194   :  { %449 = vmatmul.bf16.gmra.mxu1 %v349_v52 }
 0x195   :  { %v318_v53 = vpop.f32.mrf.mxu0 }
 0x196   :  { %v319_v54 = vadd.f32 %v817_v11, %v318_v53 }
 0x198   :  { %v340_v57 = vmax.f32 %v319_v54, 0.0 }
 0x19d   :  { %v320_v55 = vpop.f32.mrf.mxu0 }
 0x19e   :  { %v321_v56 = vadd.f32 %v817_v11, %v320_v55 }
 0x1a0   :  { %v341_v63 = vmax.f32 %v321_v56, 0.0 }
 0x1a2   :  { %v350_v1 = vpack.c.bf16 %v341_v63, %v340_v57 }
 0x1a4   :  { %454 = vmatmul.bf16.gmra.mxu1 %v350_v1 }
 0x1a5   :  { %v323_v2 = vpop.f32.mrf.mxu0 }
 0x1a6   :  { %v324_v3 = vadd.f32 %v817_v11, %v323_v2 }
 0x1a8   :  { %v342_v7 = vmax.f32 %v324_v3, 0.0 }
 0x1ad   :  { %v325_v5 = vpop.f32.mrf.mxu0 }
 0x1ae   :  { %v326_v6 = vadd.f32 %v817_v11, %v325_v5 }
 0x1b0   :  { %v343_v8 = vmax.f32 %v326_v6, 0.0 }
 0x1b2   :  { %v351_v10 = vpack.c.bf16 %v343_v8, %v342_v7 }
 0x1b4   :  { %459 = vmatmul.bf16.gmra.mxu1 %v351_v10 }
 0x1c1   :  { %v425_v12 = vpop.f32.mrf.mxu1 }
 0x1c9   :  { %v427_v13 = vpop.f32.mrf.mxu1 }
 0x1ca   :  { %v465_v14 = vpack.c.bf16 %v427_v13, %v425_v12 }
 0x1d1   :  { %v430_v15 = vpop.f32.mrf.mxu1 }
 0x1d9   :  { %v432_v16 = vpop.f32.mrf.mxu1 }
 0x1da   :  { %v466_v17 = vpack.c.bf16 %v432_v16, %v430_v15  ;;  %v542_v15 = vlaneseq }
 0x1e1   :  { %v435_v18 = vpop.f32.mrf.mxu1 }
 0x1e9   :  { %v437_v19 = vpop.f32.mrf.mxu1 }
 0x1ea   :  { %v467_v20 = vpack.c.bf16 %v437_v19, %v435_v18 }
 0x1f1   :  { %v440_v21 = vpop.f32.mrf.mxu1 }
 0x1f9   :  { %v442_v22 = vpop.f32.mrf.mxu1 }
 0x1fa   :  { %v468_v23 = vpack.c.bf16 %v442_v22, %v440_v21 }
 0x201   :  { %v445_v24 = vpop.f32.mrf.mxu1 }
 0x209   :  { %v447_v25 = vpop.f32.mrf.mxu1 }
 0x20a   :  { %v469_v34 = vpack.c.bf16 %v447_v25, %v445_v24  ;;  %v958_v24 = vmov 1.0   ;;  %v802_v25 = vld [vmem:[#allocation7 + $0x30] sm:$0xff] }
 0x211   :  { %v450_v26 = vpop.f32.mrf.mxu1 }
 0x219   :  { %v452_v11 = vpop.f32.mrf.mxu1 }
 0x21a   :  { %v470_v33 = vpack.c.bf16 %v452_v11, %v450_v26  ;;  %v801_v26 = vld [vmem:[#allocation7 + $0x28] sm:$0xff]  ;;  %v800_v11 = vld [vmem:[#allocation7 + $0x20] sm:$0xff] }
 0x221   :  { %v455_v27 = vpop.f32.mrf.mxu1 }
 0x229   :  { %v457_v28 = vpop.f32.mrf.mxu1 }
 0x22a   :  { %v471_v32 = vpack.c.bf16 %v457_v28, %v455_v27  ;;  %v799_v27 = vld [vmem:[#allocation7 + $0x18] sm:$0xff]  ;;  %v798_v28 = vld [vmem:[#allocation7 + $0x10] sm:$0xff] }
 0x231   :  { %v460_v29 = vpop.f32.mrf.mxu1 }
 0x239   :  { %v462_v30 = vpop.f32.mrf.mxu1 }
 0x23a   :  { %v472_v31 = vpack.c.bf16 %v462_v30, %v460_v29  ;;  %v797_v29 = vld [vmem:[#allocation7 + $0x8] sm:$0xff]  ;;  %v796_v30 = vld [vmem:[#allocation7] sm:$0xff] }
 0x23c   :  { %477 = vmatpush.bf16.msra.mxu2 %v472_v31 }
 0x240   :  { %478 = vmatpush.bf16.msra.mxu2 %v471_v32 }
 0x244   :  { %479 = vmatpush.bf16.msra.mxu2 %v470_v33  ;;  %v584_v33 = vld [vmem:[#allocation8] sm:$0x1] }
 0x248   :  { %480 = vmatpush.bf16.msra.mxu2 %v469_v34 }
 0x24c   :  { %481 = vmatpush.bf16.msra.mxu2 %v468_v23  ;;  %v803_v23 = vld [vmem:[#allocation7 + $0x38] sm:$0xff] }
 0x250   :  { %482 = vmatpush.bf16.msra.mxu2 %v467_v20  ;;  %v543_v20 = vand.u32 127, %v542_v15 }
 0x252   :  { %vm544_vm0 = vcmp.lt.s32.totalorder %v543_v20, 25  ;;  %vm646_vm1 = vcmp.lt.s32.totalorder %v543_v20, 4 }
 0x254   :  { %483 = vmatpush.bf16.msra.mxu2 %v466_v17 }
 0x258   :  { %484 = vmatpush.bf16.msra.mxu2 %v465_v14 }
 0x25b   :  { %485 = vmatmul.bf16.vlgmr.msra.gmra.mxu2 %v1071_v58 }
 0x26b   :  { %490 = vmatmul.bf16.gmra.mxu2 %v1077_v59 }
 0x27b   :  { %495 = vmatmul.bf16.gmra.mxu2 %v1083_v60 }
 0x28b   :  { %500 = vmatmul.bf16.gmra.mxu2 %v1089_v61 }
 0x29b   :  { %505 = vmatmul.bf16.gmra.mxu2 %v1095_v62 }
 0x2ab   :  { %510 = vmatmul.bf16.gmra.mxu2 %v1104_v0  ;;  %v818_v0 = vld [vmem:[#allocation5] ss:$0 sm:$0xff] }
 0x2bb   :  { %515 = vmatmul.bf16.gmra.mxu2 %v1119_v4 }
 0x2cb   :  { %520 = vmatmul.bf16.gmra.mxu2 %v1137_v9 }
 0x2de   :  { %v486_v35 = vpop.f32.mrf.mxu2 }
 0x2df   :  { %v487_v18 = vadd.f32 %v818_v0, %v486_v35 }
 0x2e1   :  { %v526_v22 = vmax.f32 %v487_v18, 0.0 }
 0x2e6   :  { %v488_v36 = vpop.f32.mrf.mxu2 }
 0x2e7   :  { %v489_v16 = vadd.f32 %v818_v0, %v488_v36 }
 0x2e9   :  { %v527_v21 = vmax.f32 %v489_v16, 0.0 }
 0x2ee   :  { %v491_v37 = vpop.f32.mrf.mxu2 }
 0x2ef   :  { %v492_v13 = vadd.f32 %v818_v0, %v491_v37 }
 0x2f1   :  { %v528_v19 = vmax.f32 %v492_v13, 0.0 }
 0x2f6   :  { %v493_v38 = vpop.f32.mrf.mxu2 }
 0x2f7   :  { %v494_v10 = vadd.f32 %v818_v0, %v493_v38 }
 0x2f9   :  { %v529_v17 = vmax.f32 %v494_v10, 0.0 }
 0x2fe   :  { %v496_v39 = vpop.f32.mrf.mxu2 }
 0x2ff   :  { %v497_v7 = vadd.f32 %v818_v0, %v496_v39 }
 0x301   :  { %v530_v14 = vmax.f32 %v497_v7, 0.0 }
 0x306   :  { %v498_v58 = vpop.f32.mrf.mxu2 }
 0x307   :  { %v499_v5 = vadd.f32 %v818_v0, %v498_v58 }
 0x309   :  { %v531_v12 = vmax.f32 %v499_v5, 0.0 }
 0x30e   :  { %v501_v40 = vpop.f32.mrf.mxu2 }
 0x30f   :  { %v502_v2 = vadd.f32 %v818_v0, %v501_v40 }
 0x311   :  { %v532_v8 = vmax.f32 %v502_v2, 0.0 }
 0x316   :  { %v503_v59 = vpop.f32.mrf.mxu2 }
 0x317   :  { %v504_v63 = vadd.f32 %v818_v0, %v503_v59 }
 0x319   :  { %v533_v6 = vmax.f32 %v504_v63, 0.0 }
 0x31e   :  { %v506_v41 = vpop.f32.mrf.mxu2 }
 0x31f   :  { %v507_v56 = vadd.f32 %v818_v0, %v506_v41 }
 0x321   :  { %v534_v3 = vmax.f32 %v507_v56, 0.0 }
 0x326   :  { %v508_v60 = vpop.f32.mrf.mxu2 }
 0x327   :  { %v509_v54 = vadd.f32 %v818_v0, %v508_v60 }
 0x329   :  { %v535_v1 = vmax.f32 %v509_v54, 0.0 }
 0x32e   :  { %v511_v42 = vpop.f32.mrf.mxu2 }
 0x32f   :  { %v512_v52 = vadd.f32 %v818_v0, %v511_v42 }
 0x331   :  { %v536_v57 = vmax.f32 %v512_v52, 0.0 }
 0x336   :  { %v513_v61 = vpop.f32.mrf.mxu2 }
 0x337   :  { %v514_v50 = vadd.f32 %v818_v0, %v513_v61 }
 0x339   :  { %v537_v55 = vmax.f32 %v514_v50, 0.0 }
 0x33e   :  { %v516_v43 = vpop.f32.mrf.mxu2 }
 0x33f   :  { %v517_v48 = vadd.f32 %v818_v0, %v516_v43 }
 0x341   :  { %v538_v53 = vmax.f32 %v517_v48, 0.0 }
 0x346   :  { %v518_v62 = vpop.f32.mrf.mxu2 }
 0x347   :  { %v519_v9 = vadd.f32 %v818_v0, %v518_v62 }
 0x349   :  { %v539_v51 = vmax.f32 %v519_v9, 0.0 }
 0x34e   :  { %v521_v44 = vpop.f32.mrf.mxu2 }
 0x34f   :  { %v522_v4 = vadd.f32 %v818_v0, %v521_v44 }
 0x351   :  { %v540_v49 = vmax.f32 %v522_v4, 0.0 }
 0x356   :  { %v523_v45 = vpop.f32.mrf.mxu2 }
 0x357   :  { %v524_v46 = vadd.f32 %v818_v0, %v523_v45 }
 0x359   :  { %v541_v47 = vmax.f32 %v524_v46, 0.0 }
 0x35b   :  { %547 = vmatpush.msra.mxu3 %v541_v47 }
 0x35d   :  { %548 = vmatpush.msra.mxu3 %v540_v49 }
 0x35f   :  { %549 = vmatpush.msra.mxu3 %v539_v51 }
 0x361   :  { %550 = vmatpush.msra.mxu3 %v538_v53 }
 0x363   :  { %551 = vmatpush.msra.mxu3 %v537_v55 }
 0x365   :  { %552 = vmatpush.msra.mxu3 %v536_v57 }
 0x367   :  { %553 = vmatpush.msra.mxu3 %v535_v1 }
 0x369   :  { %554 = vmatpush.msra.mxu3 %v534_v3 }
 0x36b   :  { %555 = vmatpush.msra.mxu3 %v533_v6 }
 0x36d   :  { %556 = vmatpush.msra.mxu3 %v532_v8 }
 0x36f   :  { %557 = vmatpush.msra.mxu3 %v531_v12 }
 0x371   :  { %558 = vmatpush.msra.mxu3 %v530_v14 }
 0x373   :  { %559 = vmatpush.msra.mxu3 %v529_v17 }
 0x375   :  { %560 = vmatpush.msra.mxu3 %v528_v19 }
 0x377   :  { %561 = vmatpush.msra.mxu3 %v527_v21 }
 0x379   :  { %562 = vmatpush.msra.mxu3 %v526_v22 }
 0x37a   :  { %747 = vmatmul.msk.f32.vlgmr.msra.gmra.mxu3 %vm544_vm0, %v958_v24 }
 0x37b   :  { %633 = vmatpush.bf16.msrb.mxu3 %v803_v23 }
 0x37f   :  { %634 = vmatpush.bf16.msrb.mxu3 %v802_v25 }
 0x383   :  { %635 = vmatpush.bf16.msrb.mxu3 %v801_v26 }
 0x387   :  { %636 = vmatpush.bf16.msrb.mxu3 %v800_v11 }
 0x38b   :  { %637 = vmatpush.bf16.msrb.mxu3 %v799_v27 }
 0x38f   :  { %638 = vmatpush.bf16.msrb.mxu3 %v798_v28 }
 0x393   :  { %639 = vmatpush.bf16.msrb.mxu3 %v797_v29 }
 0x397   :  { %640 = vmatpush.bf16.msrb.mxu3 %v796_v30 }
 0x3fd   :  { %v564_v31 = vpop.f32.mrf.mxu3 }
 0x3fe   :  { %v567_v32 = vpack.c.bf16 %v564_v31, %v564_v31 }
 0x400   :  { %641 = vmatmul.bf16.vlgmr.msrb.gmra.mxu3 %v567_v32 }
 0x483   :  { %v642_v34 = vpop.f32.mrf.mxu3 }
 0x484   :  { %v643_v35 = vadd.f32 %v642_v34, %v584_v33 }
 0x486   :  { %v647_v36 = vsel %vm646_vm1, %v643_v35, -1e+30 }
 0x487   :  { %v649_v37 = vsel %vm648_vm2, %v647_v36, -inf }
 0x488   :  { %650 = vmax.xlane.f32.xlu1 %v649_v37 }
 0x48b   :  { %v644_v38 = vpop.f32.mrf.mxu3 }
 0x4fb   :  { %v651_v39 = vpop.xlane.xlu1 %650 }
 0x4fc   :  { %v652_v58 = vsub.f32 %v647_v36, %v651_v39 }
 0x4fe   :  { %v653_v40 = vmul.f32 1.442695, %v652_v58 }
 0x500   :  { %819 = vpow2.f32 %v653_v40 }
 0x506   :  { %v820_v59 = vpop.eup %819 }
 0x507   :  { %v655_v41 = vsel %vm648_vm2, %v820_v59, 0.0 }
 0x508   :  { %656 = vadd.xlane.f32.xlu2 %v655_v41 }
 0x57b   :  { %v657_v60 = vpop.xlane.xlu2 %656 }
 0x57c   :  { %821 = vlog2.f32 %v657_v60 }
 0x582   :  { %v822_v42 = vpop.eup %821 }
 0x583   :  { %v659_v61 = vmul.f32 0.6931472, %v822_v42 }
 0x585   :  { %v660_v43 = vadd.f32 %v659_v61, %v651_v39 }
 0x587   :  { %v661_v62 = vsub.f32 %v647_v36, %v660_v43 }
 0x589   :  { %662 = vst [vmem:[#allocation10] sm:$0x1] %v661_v62 }
 0x58a   :  { %673 = dma.vmem_to_hbm [thread:$0]  %s669_s4, 16, %s671_s13, [#allocation4]  }
 0x58b   :  { %949 = dma.done.wait [#allocation4], 16  }
 0x58c   :  { %950 = vsyncadd [#allocation4], 4294967280 }
 0x58d   :  { %678 = vsyncpa [#allocation3], 1 }
 0x58e   :  { %679 = vsyncpa [#allocation6], 1 }
 0x58f   :  { %680 = vsyncpa [#allocation9], 1 }
 0x590   :  { %681 = vsyncpa [#allocation4], 1 }

</bundles_post_ra>
